<compile_context>
chip_gen: v5e
topology: v5e:2x2
jax: 0.10.0
libtpu: 0.0.40
codegen_flags: <defaults>
</compile_context>

<pallas_src>
import functools

import jax
import jax.numpy as jnp
from jax import lax
from jax.experimental import pallas as pl
from jax.experimental.pallas import tpu as pltpu

LN_EPS = 1e-5                       # PyTorch nn.LayerNorm default
_INV_SQRT2 = 0.7071067811865476
MATMUL_DTYPE = jnp.float32          # set to jnp.bfloat16 for faster (non bit-exact) MXU


# ----------------------------------------------------------------------------------
# Kernel
# ----------------------------------------------------------------------------------
def _ffn(y, w1, b1, w2, b2, mm_dtype):
    """Linear2(GELU(Linear1(LN_noaffine(y)))).  LN affine is pre-folded into (w1,b1).
    Dropout p=0 -> identity."""
    mean = jnp.mean(y, axis=-1, keepdims=True)
    var = jnp.mean(jnp.square(y - mean), axis=-1, keepdims=True)
    yn = (y - mean) * lax.rsqrt(var + LN_EPS)
    h = jnp.dot(yn.astype(mm_dtype), w1.astype(mm_dtype),
                preferred_element_type=jnp.float32) + b1
    h = 0.5 * h * (1.0 + lax.erf(h * _INV_SQRT2))        # exact GELU (nn.GELU default)
    z = jnp.dot(h.astype(mm_dtype), w2.astype(mm_dtype),
                preferred_element_type=jnp.float32) + b2
    return z


def _mixer_block_kernel(x_ref, w1a_ref, b1a_ref, w2a_ref, b2a_ref,
                        w1c_ref, b1c_ref, w2c_ref, b2c_ref, o_ref,
                        *, ant, car, mm_dtype):
    # x_ref: (car, 2*ant) for one batch element, features in '(c ant)' order.
    v = x_ref[...].astype(jnp.float32)

    # ---- ant mixing: rows = car, features = 2*ant ----
    v = v + _ffn(v, w1a_ref[...], b1a_ref[...], w2a_ref[...], b2a_ref[...], mm_dtype)

    # Relayout 'car (c ant)' -> 'ant (c car)': one small transpose + lane concat.
    vt = v.T                                                   # (2*ant, car)
    u = jnp.concatenate([vt[:ant, :], vt[ant:, :]], axis=1)    # (ant, 2*car)

    # ---- car mixing: rows = ant, features = 2*car ----
    u = u + _ffn(u, w1c_ref[...], b1c_ref[...], w2c_ref[...], b2c_ref[...], mm_dtype)

    o_ref[...] = u.astype(o_ref.dtype)


# ----------------------------------------------------------------------------------
# Parameter preparation (trace-time, outside the kernel)
# ----------------------------------------------------------------------------------
def _prep_mix_params(params):
    """Permute the feature layout '(x c)' -> '(c x)' and fold LN affine into Linear1."""
    ln_w, ln_b, w1, b1, w2, b2 = params          # (D,), (D,), (D,H), (H,), (H,D), (D,)
    dim, hidden = w1.shape
    half = dim // 2
    d = jnp.arange(dim)
    perm = (d % half) * 2 + d // half            # new index -> old (interleaved) index
    lnw_p, lnb_p = ln_w[perm], ln_b[perm]
    w1_p = w1[perm, :]
    w1_f = lnw_p[:, None] * w1_p                             # fold LN scale
    b1_f = (lnb_p @ w1_p + b1).reshape(1, hidden)            # fold LN shift
    w2_p = w2[:, perm]
    b2_p = b2[perm].reshape(1, dim)
    return w1_f, b1_f, w2_p, b2_p


# ----------------------------------------------------------------------------------
# Wrapper: single fused pallas_call per MixerBlock_2D
# ----------------------------------------------------------------------------------
def mixer_block_2d(x, ant_params, car_params):
    """x: (b, ant, car, 2) float32 -> same shape.  Matches MixerBlock_2D.forward."""
    b, ant, car, c = x.shape
    assert c == 2
    da, dc = 2 * ant, 2 * car

    w1a, b1a, w2a, b2a = _prep_mix_params(ant_params)
    w1c, b1c, w2c, b2c = _prep_mix_params(car_params)
    ha, hc = w1a.shape[1], w1c.shape[1]

    # 'b ant car c' -> 'b car (c ant)'  (single cheap XLA transpose, once per block)
    x_in = jnp.transpose(x, (0, 2, 3, 1)).reshape(b, car, da)

    kernel = functools.partial(_mixer_block_kernel, ant=ant, car=car,
                               mm_dtype=MATMUL_DTYPE)
    const2d = lambda i: (0, 0)

    out = pl.pallas_call(
        kernel,
        out_shape=jax.ShapeDtypeStruct((b, ant, dc), x.dtype),
        grid=(b,),
        in_specs=[
            pl.BlockSpec((None, car, da), lambda i: (i, 0, 0)),  # x, one batch element
            pl.BlockSpec((da, ha), const2d),    # ant W1 (LN-folded, layout-permuted)
            pl.BlockSpec((1, ha), const2d),     # ant b1
            pl.BlockSpec((ha, da), const2d),    # ant W2
            pl.BlockSpec((1, da), const2d),     # ant b2
            pl.BlockSpec((dc, hc), const2d),    # car W1
            pl.BlockSpec((1, hc), const2d),     # car b1
            pl.BlockSpec((hc, dc), const2d),    # car W2
            pl.BlockSpec((1, dc), const2d),     # car b2
        ],
        out_specs=pl.BlockSpec((None, ant, dc), lambda i: (i, 0, 0)),
        compiler_params=pltpu.CompilerParams(
            dimension_semantics=("parallel",),          # shard batch over v7x's 2 TCs
            vmem_limit_bytes=32 * 1024 * 1024,          # plenty for these shapes
        ),
    )(x_in, w1a, b1a, w2a, b2a, w1c, b1c, w2c, b2c)

    # 'b ant (c car)' -> 'b ant car c'
    return jnp.transpose(out.reshape(b, ant, 2, car), (0, 1, 3, 2))


# ----------------------------------------------------------------------------------
# Synthetic parameter init (PyTorch-like scales) and pure-JAX reference
# ----------------------------------------------------------------------------------
def init_mix_params(key, dim):
    """LayerNorm(dim) + Linear(dim, 2*dim) + Linear(2*dim, dim) parameters."""
    hidden = 2 * dim
    k1, k2, k3, k4, k5, k6 = jax.random.split(key, 6)
    lim1, lim2 = 1.0 / jnp.sqrt(dim), 1.0 / jnp.sqrt(hidden)
    w1 = jax.random.uniform(k1, (dim, hidden), jnp.float32, -lim1, lim1)
    b1 = jax.random.uniform(k2, (hidden,), jnp.float32, -lim1, lim1)
    w2 = jax.random.uniform(k3, (hidden, dim), jnp.float32, -lim2, lim2)
    b2 = jax.random.uniform(k4, (dim,), jnp.float32, -lim2, lim2)
    ln_w = 1.0 + 0.1 * jax.random.normal(k5, (dim,), jnp.float32)
    ln_b = 0.05 * jax.random.normal(k6, (dim,), jnp.float32)
    return ln_w, ln_b, w1, b1, w2, b2


def _mix_ref(y, params):
    ln_w, ln_b, w1, b1, w2, b2 = params
    mean = jnp.mean(y, axis=-1, keepdims=True)
    var = jnp.mean(jnp.square(y - mean), axis=-1, keepdims=True)
    yn = (y - mean) / jnp.sqrt(var + LN_EPS) * ln_w + ln_b
    h = yn @ w1 + b1
    h = 0.5 * h * (1.0 + lax.erf(h * _INV_SQRT2))
    return h @ w2 + b2


def mixer_block_2d_ref(x, ant_params, car_params):
    """Pure-JAX mirror of the PyTorch MixerBlock_2D.forward (interleaved layouts)."""
    b, ant, car, c = x.shape
    xa = jnp.transpose(x, (0, 2, 1, 3)).reshape(b, car, ant * c)   # 'b car (ant c)'
    xa = xa + _mix_ref(xa, ant_params)
    x = jnp.transpose(xa.reshape(b, car, ant, c), (0, 2, 1, 3))    # 'b ant car c'
    xc = x.reshape(b, ant, car * c)                                # 'b ant (car c)'
    xc = xc + _mix_ref(xc, car_params)
    return xc.reshape(b, ant, car, c)


# ----------------------------------------------------------------------------------
if __name__ == "__main__":
    batch, ant_size, car_size = 2, 8, 16

    key = jax.random.PRNGKey(0)
    kx, ka, kc = jax.random.split(key, 3)
    x = jax.random.normal(kx, (batch, ant_size, car_size, 2), jnp.float32)
    ant_params = init_mix_params(ka, ant_size * 2)
    car_params = init_mix_params(kc, car_size * 2)

    out = jax.jit(mixer_block_2d)(x, ant_params, car_params)
    jax.block_until_ready(out)
    assert out.shape == x.shape and out.dtype == x.dtype

    ref = mixer_block_2d_ref(x, ant_params, car_params)
    err = float(jnp.max(jnp.abs(out - ref)))
    assert err < 5e-2, f"kernel vs reference max abs error {err}"

    print("KERNEL_OK")
</pallas_src>

<mosaic_0001>
module attributes {stable_mosaic.version = 11 : i64} {
  func.func @_mixer_block_kernel(%arg0: i32, %arg1: memref<1x16x16xf32, #tpu.memory_space<vmem>>, %arg2: memref<16x32xf32, #tpu.memory_space<vmem>>, %arg3: memref<1x32xf32, #tpu.memory_space<vmem>>, %arg4: memref<32x16xf32, #tpu.memory_space<vmem>>, %arg5: memref<1x16xf32, #tpu.memory_space<vmem>>, %arg6: memref<32x64xf32, #tpu.memory_space<vmem>>, %arg7: memref<1x64xf32, #tpu.memory_space<vmem>>, %arg8: memref<64x32xf32, #tpu.memory_space<vmem>>, %arg9: memref<1x32xf32, #tpu.memory_space<vmem>>, %arg10: memref<1x8x32xf32, #tpu.memory_space<vmem>>) attributes {dimension_semantics = [#tpu.dimension_semantics<parallel>], iteration_bounds = array<i64: 2>, scalar_prefetch = 0 : i64, scratch_operands = 0 : i64, tpu.core_type = #tpu.core_type<tc>, window_params = [{transform_indices = @transform_0, window_bounds = array<i64: 1, 16, 16>}, {pipeline_mode = #tpu.pipeline_mode<synchronous>, transform_indices = @transform_1, window_bounds = array<i64: 16, 32>}, {pipeline_mode = #tpu.pipeline_mode<synchronous>, transform_indices = @transform_2, window_bounds = array<i64: 1, 32>}, {pipeline_mode = #tpu.pipeline_mode<synchronous>, transform_indices = @transform_3, window_bounds = array<i64: 32, 16>}, {pipeline_mode = #tpu.pipeline_mode<synchronous>, transform_indices = @transform_4, window_bounds = array<i64: 1, 16>}, {pipeline_mode = #tpu.pipeline_mode<synchronous>, transform_indices = @transform_5, window_bounds = array<i64: 32, 64>}, {pipeline_mode = #tpu.pipeline_mode<synchronous>, transform_indices = @transform_6, window_bounds = array<i64: 1, 64>}, {pipeline_mode = #tpu.pipeline_mode<synchronous>, transform_indices = @transform_7, window_bounds = array<i64: 64, 32>}, {pipeline_mode = #tpu.pipeline_mode<synchronous>, transform_indices = @transform_8, window_bounds = array<i64: 1, 32>}, {transform_indices = @transform_9, window_bounds = array<i64: 1, 8, 32>}]} {
    %c0 = arith.constant 0 : index
    %c0_0 = arith.constant 0 : index
    %c0_1 = arith.constant 0 : index
    %0 = vector.load %arg1[%c0, %c0_0, %c0_1] : memref<1x16x16xf32, #tpu.memory_space<vmem>>, vector<1x16x16xf32>
    %1 = vector.shape_cast %0 : vector<1x16x16xf32> to vector<16x16xf32>
    %c0_2 = arith.constant 0 : index
    %c0_3 = arith.constant 0 : index
    %2 = vector.load %arg2[%c0_2, %c0_3] : memref<16x32xf32, #tpu.memory_space<vmem>>, vector<16x32xf32>
    %c0_4 = arith.constant 0 : index
    %c0_5 = arith.constant 0 : index
    %3 = vector.load %arg3[%c0_4, %c0_5] : memref<1x32xf32, #tpu.memory_space<vmem>>, vector<1x32xf32>
    %c0_6 = arith.constant 0 : index
    %c0_7 = arith.constant 0 : index
    %4 = vector.load %arg4[%c0_6, %c0_7] : memref<32x16xf32, #tpu.memory_space<vmem>>, vector<32x16xf32>
    %c0_8 = arith.constant 0 : index
    %c0_9 = arith.constant 0 : index
    %5 = vector.load %arg5[%c0_8, %c0_9] : memref<1x16xf32, #tpu.memory_space<vmem>>, vector<1x16xf32>
    %cst = arith.constant dense<0.000000e+00> : vector<16xf32>
    %6 = vector.multi_reduction <add>, %1, %cst [1] : vector<16x16xf32> to vector<16xf32>
    %7 = vector.shape_cast %6 : vector<16xf32> to vector<16x1xf32>
    %cst_10 = arith.constant 1.600000e+01 : f32
    %8 = vector.broadcast %cst_10 : f32 to vector<16x1xf32>
    %9 = arith.divf %7, %8 : vector<16x1xf32>
    %10 = vector.broadcast %9 : vector<16x1xf32> to vector<16x16xf32>
    %11 = arith.subf %1, %10 : vector<16x16xf32>
    %12 = arith.mulf %11, %11 : vector<16x16xf32>
    %cst_11 = arith.constant dense<0.000000e+00> : vector<16xf32>
    %13 = vector.multi_reduction <add>, %12, %cst_11 [1] : vector<16x16xf32> to vector<16xf32>
    %14 = vector.shape_cast %13 : vector<16xf32> to vector<16x1xf32>
    %cst_12 = arith.constant 1.600000e+01 : f32
    %15 = vector.broadcast %cst_12 : f32 to vector<16x1xf32>
    %16 = arith.divf %14, %15 : vector<16x1xf32>
    %17 = vector.broadcast %9 : vector<16x1xf32> to vector<16x16xf32>
    %18 = arith.subf %1, %17 : vector<16x16xf32>
    %cst_13 = arith.constant 9.99999974E-6 : f32
    %19 = vector.broadcast %cst_13 : f32 to vector<16x1xf32>
    %20 = arith.addf %16, %19 : vector<16x1xf32>
    %21 = math.rsqrt %20 : vector<16x1xf32>
    %22 = vector.broadcast %21 : vector<16x1xf32> to vector<16x16xf32>
    %23 = arith.mulf %18, %22 : vector<16x16xf32>
    %cst_14 = arith.constant dense<0.000000e+00> : vector<16x32xf32>
    %24 = tpu.matmul %23, %2, %cst_14 {dimension_numbers = #tpu.dot_dimension_numbers<[1], [0], [0], [1], [0, 0, 1, 1], [], []>} : vector<16x16xf32>, vector<16x32xf32>, vector<16x32xf32> -> vector<16x32xf32>
    %25 = vector.broadcast %3 : vector<1x32xf32> to vector<16x32xf32>
    %26 = arith.addf %24, %25 : vector<16x32xf32>
    %cst_15 = arith.constant 5.000000e-01 : f32
    %27 = vector.broadcast %cst_15 : f32 to vector<16x32xf32>
    %28 = arith.mulf %27, %26 : vector<16x32xf32>
    %cst_16 = arith.constant 0.707106769 : f32
    %29 = vector.broadcast %cst_16 : f32 to vector<16x32xf32>
    %30 = arith.mulf %26, %29 : vector<16x32xf32>
    %31 = math.erf %30 : vector<16x32xf32>
    %cst_17 = arith.constant 1.000000e+00 : f32
    %32 = vector.broadcast %cst_17 : f32 to vector<16x32xf32>
    %33 = arith.addf %32, %31 : vector<16x32xf32>
    %34 = arith.mulf %28, %33 : vector<16x32xf32>
    %cst_18 = arith.constant dense<0.000000e+00> : vector<16x16xf32>
    %35 = tpu.matmul %34, %4, %cst_18 {dimension_numbers = #tpu.dot_dimension_numbers<[1], [0], [0], [1], [0, 0, 1, 1], [], []>} : vector<16x32xf32>, vector<32x16xf32>, vector<16x16xf32> -> vector<16x16xf32>
    %36 = vector.broadcast %5 : vector<1x16xf32> to vector<16x16xf32>
    %37 = arith.addf %35, %36 : vector<16x16xf32>
    %38 = arith.addf %1, %37 : vector<16x16xf32>
    %39 = tpu.transpose %38, [1, 0] : vector<16x16xf32> -> vector<16x16xf32>
    %40 = vector.extract_strided_slice %39 {offsets = [0, 0], sizes = [8, 16], strides = [1, 1]} : vector<16x16xf32> to vector<8x16xf32>
    %41 = vector.extract_strided_slice %39 {offsets = [8, 0], sizes = [8, 16], strides = [1, 1]} : vector<16x16xf32> to vector<8x16xf32>
    %42 = tpu.concatenate %40, %41 in 1 : vector<8x16xf32>, vector<8x16xf32> -> vector<8x32xf32>
    %c0_19 = arith.constant 0 : index
    %c0_20 = arith.constant 0 : index
    %43 = vector.load %arg6[%c0_19, %c0_20] : memref<32x64xf32, #tpu.memory_space<vmem>>, vector<32x64xf32>
    %c0_21 = arith.constant 0 : index
    %c0_22 = arith.constant 0 : index
    %44 = vector.load %arg7[%c0_21, %c0_22] : memref<1x64xf32, #tpu.memory_space<vmem>>, vector<1x64xf32>
    %c0_23 = arith.constant 0 : index
    %c0_24 = arith.constant 0 : index
    %45 = vector.load %arg8[%c0_23, %c0_24] : memref<64x32xf32, #tpu.memory_space<vmem>>, vector<64x32xf32>
    %c0_25 = arith.constant 0 : index
    %c0_26 = arith.constant 0 : index
    %46 = vector.load %arg9[%c0_25, %c0_26] : memref<1x32xf32, #tpu.memory_space<vmem>>, vector<1x32xf32>
    %cst_27 = arith.constant dense<0.000000e+00> : vector<8xf32>
    %47 = vector.multi_reduction <add>, %42, %cst_27 [1] : vector<8x32xf32> to vector<8xf32>
    %48 = vector.shape_cast %47 : vector<8xf32> to vector<8x1xf32>
    %cst_28 = arith.constant 3.200000e+01 : f32
    %49 = vector.broadcast %cst_28 : f32 to vector<8x1xf32>
    %50 = arith.divf %48, %49 : vector<8x1xf32>
    %51 = vector.broadcast %50 : vector<8x1xf32> to vector<8x32xf32>
    %52 = arith.subf %42, %51 : vector<8x32xf32>
    %53 = arith.mulf %52, %52 : vector<8x32xf32>
    %cst_29 = arith.constant dense<0.000000e+00> : vector<8xf32>
    %54 = vector.multi_reduction <add>, %53, %cst_29 [1] : vector<8x32xf32> to vector<8xf32>
    %55 = vector.shape_cast %54 : vector<8xf32> to vector<8x1xf32>
    %cst_30 = arith.constant 3.200000e+01 : f32
    %56 = vector.broadcast %cst_30 : f32 to vector<8x1xf32>
    %57 = arith.divf %55, %56 : vector<8x1xf32>
    %58 = vector.broadcast %50 : vector<8x1xf32> to vector<8x32xf32>
    %59 = arith.subf %42, %58 : vector<8x32xf32>
    %cst_31 = arith.constant 9.99999974E-6 : f32
    %60 = vector.broadcast %cst_31 : f32 to vector<8x1xf32>
    %61 = arith.addf %57, %60 : vector<8x1xf32>
    %62 = math.rsqrt %61 : vector<8x1xf32>
    %63 = vector.broadcast %62 : vector<8x1xf32> to vector<8x32xf32>
    %64 = arith.mulf %59, %63 : vector<8x32xf32>
    %cst_32 = arith.constant dense<0.000000e+00> : vector<8x64xf32>
    %65 = tpu.matmul %64, %43, %cst_32 {dimension_numbers = #tpu.dot_dimension_numbers<[1], [0], [0], [1], [0, 0, 1, 1], [], []>} : vector<8x32xf32>, vector<32x64xf32>, vector<8x64xf32> -> vector<8x64xf32>
    %66 = vector.broadcast %44 : vector<1x64xf32> to vector<8x64xf32>
    %67 = arith.addf %65, %66 : vector<8x64xf32>
    %cst_33 = arith.constant 5.000000e-01 : f32
    %68 = vector.broadcast %cst_33 : f32 to vector<8x64xf32>
    %69 = arith.mulf %68, %67 : vector<8x64xf32>
    %cst_34 = arith.constant 0.707106769 : f32
    %70 = vector.broadcast %cst_34 : f32 to vector<8x64xf32>
    %71 = arith.mulf %67, %70 : vector<8x64xf32>
    %72 = math.erf %71 : vector<8x64xf32>
    %cst_35 = arith.constant 1.000000e+00 : f32
    %73 = vector.broadcast %cst_35 : f32 to vector<8x64xf32>
    %74 = arith.addf %73, %72 : vector<8x64xf32>
    %75 = arith.mulf %69, %74 : vector<8x64xf32>
    %cst_36 = arith.constant dense<0.000000e+00> : vector<8x32xf32>
    %76 = tpu.matmul %75, %45, %cst_36 {dimension_numbers = #tpu.dot_dimension_numbers<[1], [0], [0], [1], [0, 0, 1, 1], [], []>} : vector<8x64xf32>, vector<64x32xf32>, vector<8x32xf32> -> vector<8x32xf32>
    %77 = vector.broadcast %46 : vector<1x32xf32> to vector<8x32xf32>
    %78 = arith.addf %76, %77 : vector<8x32xf32>
    %79 = arith.addf %42, %78 : vector<8x32xf32>
    %c0_37 = arith.constant 0 : index
    %c0_38 = arith.constant 0 : index
    %c0_39 = arith.constant 0 : index
    %80 = vector.load %arg10[%c0_37, %c0_38, %c0_39] : memref<1x8x32xf32, #tpu.memory_space<vmem>>, vector<1x8x32xf32>
    %81 = vector.shape_cast %80 : vector<1x8x32xf32> to vector<8x32xf32>
    %82 = vector.shape_cast %79 : vector<8x32xf32> to vector<1x8x32xf32>
    tpu.vector_store %arg10[%c0_37, %c0_38, %c0_39], %82 {strides = array<i32>} : memref<1x8x32xf32, #tpu.memory_space<vmem>>, vector<1x8x32xf32>,
    return
  }
  func.func @transform_0(%arg0: i32) -> (i32, i32, i32) {
    %c0_i32 = arith.constant 0 : i32
    %c0_i32_0 = arith.constant 0 : i32
    %c0_i32_1 = arith.constant 0 : i32
    return %arg0, %c0_i32, %c0_i32_0 : i32, i32, i32
  }
  func.func @transform_1(%arg0: i32) -> (i32, i32) {
    %c0_i32 = arith.constant 0 : i32
    %c0_i32_0 = arith.constant 0 : i32
    %c0_i32_1 = arith.constant 0 : i32
    return %c0_i32, %c0_i32_0 : i32, i32
  }
  func.func @transform_2(%arg0: i32) -> (i32, i32) {
    %c0_i32 = arith.constant 0 : i32
    %c0_i32_0 = arith.constant 0 : i32
    %c0_i32_1 = arith.constant 0 : i32
    return %c0_i32, %c0_i32_0 : i32, i32
  }
  func.func @transform_3(%arg0: i32) -> (i32, i32) {
    %c0_i32 = arith.constant 0 : i32
    %c0_i32_0 = arith.constant 0 : i32
    %c0_i32_1 = arith.constant 0 : i32
    return %c0_i32, %c0_i32_0 : i32, i32
  }
  func.func @transform_4(%arg0: i32) -> (i32, i32) {
    %c0_i32 = arith.constant 0 : i32
    %c0_i32_0 = arith.constant 0 : i32
    %c0_i32_1 = arith.constant 0 : i32
    return %c0_i32, %c0_i32_0 : i32, i32
  }
  func.func @transform_5(%arg0: i32) -> (i32, i32) {
    %c0_i32 = arith.constant 0 : i32
    %c0_i32_0 = arith.constant 0 : i32
    %c0_i32_1 = arith.constant 0 : i32
    return %c0_i32, %c0_i32_0 : i32, i32
  }
  func.func @transform_6(%arg0: i32) -> (i32, i32) {
    %c0_i32 = arith.constant 0 : i32
    %c0_i32_0 = arith.constant 0 : i32
    %c0_i32_1 = arith.constant 0 : i32
    return %c0_i32, %c0_i32_0 : i32, i32
  }
  func.func @transform_7(%arg0: i32) -> (i32, i32) {
    %c0_i32 = arith.constant 0 : i32
    %c0_i32_0 = arith.constant 0 : i32
    %c0_i32_1 = arith.constant 0 : i32
    return %c0_i32, %c0_i32_0 : i32, i32
  }
  func.func @transform_8(%arg0: i32) -> (i32, i32) {
    %c0_i32 = arith.constant 0 : i32
    %c0_i32_0 = arith.constant 0 : i32
    %c0_i32_1 = arith.constant 0 : i32
    return %c0_i32, %c0_i32_0 : i32, i32
  }
  func.func @transform_9(%arg0: i32) -> (i32, i32, i32) {
    %c0_i32 = arith.constant 0 : i32
    %c0_i32_0 = arith.constant 0 : i32
    %c0_i32_1 = arith.constant 0 : i32
    return %arg0, %c0_i32, %c0_i32_0 : i32, i32, i32
  }
}

</mosaic_0001>

<bundles_post_ra>
// kernel: mixer_block_2d.1
= control target key start
LH: loop header
LB: loop body
LE: loop exit
PB: predicated region body
PF: predicated region fallthrough
CT: control target
= control target key end

     0   :  { %s893_s30 = smov 0   ;;  %s1026_s0 = inlined_call_operand.vmem [shape: f32[2,16,16], index: 0, kind: input, shape index: {}]   ;;  %s1027_s1 = inlined_call_operand.vmem [shape: f32[16,32], index: 1, kind: input, shape index: {}]   ;;  %s1028_s2 = inlined_call_operand.vmem [shape: f32[1,32], index: 2, kind: input, shape index: {}]   ;;  %s1029_s3 = inlined_call_operand.vmem [shape: f32[32,16], index: 3, kind: input, shape index: {}]   ;;  %s1030_s4 = inlined_call_operand.vmem [shape: f32[1,16], index: 4, kind: input, shape index: {}]   ;;  %s1031_s5 = inlined_call_operand.vmem [shape: f32[32,64], index: 5, kind: input, shape index: {}]   ;;  %s1032_s6 = inlined_call_operand.vmem [shape: f32[1,64], index: 6, kind: input, shape index: {}]   ;;  %s1033_s7 = inlined_call_operand.vmem [shape: f32[64,32], index: 7, kind: input, shape index: {}]   ;;  %s1034_s8 = inlined_call_operand.vmem [shape: f32[1,32], index: 8, kind: input, shape index: {}]   ;;  %s1035_s9 = inlined_call_operand.vmem [shape: f32[2,8,32], index: 9, kind: output, shape index: {}]  }
   0x1 LB: > { %s780_s10 = sadd.s32 4294967295, %s838_s30   ;;  %p784_p0 = scmp.ge.s32.totalorder %s838_s30, 1  ;;  %s838_s30 = sphi %s893_s30, %s19_s30  }
   0x2   : > { %p287_p1 = scmp.lt.s32.totalorder %s838_s30, 3 }
   0x4   : > { %p288_p2 = pnand %p784_p0, %p287_p1 }
   0x5   : > { %p322_p3 = scmp.lt.s32.totalorder (!%p288_p2), %s780_s10, 1  ;;  %s841_s12 = smov (!%p288_p2), 16  }
   0x6   : > { %291 = sbr.rel (%p288_p2) target bundleno = 1452 (0x5ac), region = 56 }
   0xb   : > { %s1037_s10 = smov (!%p322_p3, %s780_s10), 1  ;;  %vm341_vm0 = vcmask 130048   ;;  %v840_v4 = vmov 16.0   ;;  %v334_v21 = vld [vmem:[%s1027_s1 + $0x8] sm:$0xff]  ;;  %v333_v22 = vld [vmem:[%s1027_s1] sm:$0xff]  ;;  %vm516_vm14 = vcmask 261120  }
   0xc   : > { %s799_s11 = sshll.u32 %s1037_s10, 4  ;;  %816 = vrcp.f32 %v840_v4  ;;  %416 = vmatpush.msra.mxu0 %v334_v21  ;;  %v812_v45 = vld [vmem:[%s1028_s2] ss:$0 sm:$0xff]  ;;  %s787_s22 = sshll.u32 %s1037_s10, 3 }
   0xd   : > { %s326_s14 = scalar_lea.vmem %s1026_s0, %s799_s11  ;;  %s330_s25 = scalar_lea.vmem %s1035_s9, %s787_s22 }
   0xe   : > { %v907_v0 = vld [vmem:[%s326_s14] sm:$0xff]  ;;  %v911_v2 = vld [vmem:[%s326_s14 + $0x8] sm:$0xff]  ;;  %417 = vmatpush.msra.mxu0 %v333_v22 }
   0xf   : > { %v342_v1 = vsel %vm341_vm0, %v907_v0, 0.0  ;;  %v345_v3 = vsel %vm341_vm0, %v911_v2, 0.0 }
  0x10   : > { %343 = vadd.xlane.f32.xlu0 %v342_v1  ;;  %v339_v1 = vld [vmem:[%s1029_s3 + $0x18] sm:$0xff] }
  0x11   : > { %535 = vmatpush.msra.mxu1 %v339_v1 }
  0x12   : > { %v817_v5 = vpop.eup %816 }
  0x13   : > { %v349_v6 = vmul.f32 16.0, %v817_v5  ;;  %vm353_vm1 = vweird.f32 %v817_v5 }
  0x15   : > { %v350_v7 = vsub.f32 1.0, %v349_v6  ;;  %v338_v6 = vld [vmem:[%s1029_s3 + $0x10] sm:$0xff] }
  0x16   : > { %536 = vmatpush.msra.mxu1 %v338_v6 }
  0x17   : > { %v351_v8 = vmul.f32 %v817_v5, %v350_v7 }
  0x18   : > { %346 = vadd.xlane.f32.xlu0 %v345_v3 }
  0x19   : > { %v352_v9 = vadd.f32 %v817_v5, %v351_v8 }
  0x1b   : > { %v354_v10 = vsel %vm353_vm1, %v817_v5, %v352_v9 }
  0x83   : > { %v344_v11 = vpop.xlane.xlu0 %343 }
  0x84   : > { %v355_v12 = vmul.f32 %v354_v10, %v344_v11  ;;  %v337_v11 = vld [vmem:[%s1029_s3 + $0x8] sm:$0xff] }
  0x85   : > { %537 = vmatpush.msra.mxu1 %v337_v11 }
  0x86   : > { %v357_v13 = vsub.f32 %v907_v0, %v355_v12 }
  0x88   : > { %v359_v14 = vmul.f32 %v357_v13, %v357_v13 }
  0x8a   : > { %v361_v15 = vsel %vm341_vm0, %v359_v14, 0.0 }
  0x8b   : > { %362 = vadd.xlane.f32.xlu1 %v361_v15  ;;  %v347_v16 = vpop.xlane.xlu0 %346  ;;  %v336_v15 = vld [vmem:[%s1029_s3] sm:$0xff] }
  0x8c   : > { %v356_v17 = vmul.f32 %v354_v10, %v347_v16  ;;  %538 = vmatpush.msra.mxu1 %v336_v15 }
  0x8e   : > { %v358_v18 = vsub.f32 %v911_v2, %v356_v17 }
  0x90   : > { %v360_v19 = vmul.f32 %v358_v18, %v358_v18 }
  0x92   : > { %v364_v20 = vsel %vm341_vm0, %v360_v19, 0.0 }
  0x93   : > { %365 = vadd.xlane.f32.xlu1 %v364_v20 }
  0xfe   : > { %v363_v23 = vpop.xlane.xlu1 %362 }
  0xff   : > { %v367_v24 = vmul.f32 %v363_v23, %v354_v10 }
 0x101   : > { %v369_v25 = vadd.f32 1e-05, %v367_v24 }
 0x103   : > { %818 = vrsqrt.f32 %v369_v25  ;;  %vm377_vm3 = vweird.f32 %v369_v25 }
 0x106   : > { %v366_v26 = vpop.xlane.xlu1 %365 }
 0x107   : > { %v368_v27 = vmul.f32 %v366_v26, %v354_v10 }
 0x109   : > { %v819_v28 = vpop.eup %818  ;;  %v370_v29 = vadd.f32 1e-05, %v368_v27 }
 0x10a   : > { %v372_v30 = vmul.f32 %v819_v28, %v369_v25  ;;  %vm378_vm2 = vweird.f32 %v819_v28 }
 0x10b   : > { %820 = vrsqrt.f32 %v370_v29  ;;  %vm379_vm4 = vmor %vm377_vm3, %vm378_vm2  ;;  %vm387_vm6 = vweird.f32 %v370_v29 }
 0x10c   : > { %v373_v31 = vmul.f32 %v819_v28, %v372_v30 }
 0x10e   : > { %v374_v32 = vmul.f32 0.5, %v373_v31 }
 0x110   : > { %v375_v33 = vsub.f32 1.5, %v374_v32 }
 0x111   : > { %v821_v34 = vpop.eup %820 }
 0x112   : > { %v382_v35 = vmul.f32 %v821_v34, %v370_v29  ;;  %v376_v36 = vmul.f32 %v819_v28, %v375_v33  ;;  %vm388_vm5 = vweird.f32 %v821_v34 }
 0x113   : > { %vm389_vm7 = vmor %vm387_vm6, %vm388_vm5 }
 0x114   : > { %v383_v37 = vmul.f32 %v821_v34, %v382_v35  ;;  %v380_v38 = vsel %vm379_vm4, %v819_v28, %v376_v36 }
 0x115   : > { %v391_v39 = vmul.f32 %v380_v38, %v357_v13 }
 0x116   : > { %v384_v40 = vmul.f32 0.5, %v383_v37 }
 0x117   : > { %788 = vmatmul.msk.f32.vlgmr.msra.gmra.mxu0 %vm341_vm0, %v391_v39 }
 0x118   : > { %v385_v41 = vsub.f32 1.5, %v384_v40 }
 0x11a   : > { %v386_v42 = vmul.f32 %v821_v34, %v385_v41 }
 0x11c   : > { %v390_v43 = vsel %vm389_vm7, %v821_v34, %v386_v42 }
 0x11d   : > { %v392_v44 = vmul.f32 %v390_v43, %v358_v18 }
 0x11f   : > { %789 = vmatmul.msk.f32.gmra.mxu0 %vm341_vm0, %v392_v44 }
 0x194   : > { %v419_v46 = vpop.f32.mrf.mxu0 }
 0x195   : > { %v930_v47 = vadd.f32 %v812_v45, %v419_v46 }
 0x197   : > { %v933_v48 = vmul.f32 0.70710677, %v930_v47 }
 0x199   : > { %v429_v49 = vmul.f32 %v933_v48, %v933_v48 }
 0x19b   : > { %v430_v50 = vmin.f32 %v429_v49, 16.0 }
 0x19c   : > { %v422_v51 = vpop.f32.mrf.mxu0 }
 0x19d   : > { %v431_v52 = vmul.f32 2.1237322e-06, %v430_v50  ;;  %v442_v53 = vmul.f32 3.8918573e-05, %v430_v50  ;;  %v937_v54 = vadd.f32 %v812_v45, %v422_v51 }
 0x19f   : > { %v432_v55 = vadd.f32 0.00028619796, %v431_v52  ;;  %v443_v56 = vadd.f32 0.001143296, %v442_v53  ;;  %v940_v57 = vmul.f32 0.70710677, %v937_v54 }
 0x1a1   : > { %v433_v58 = vmul.f32 %v432_v55, %v430_v50  ;;  %v444_v59 = vmul.f32 %v443_v56, %v430_v50  ;;  %v469_v60 = vmul.f32 %v940_v57, %v940_v57 }
 0x1a3   : > { %v445_v61 = vadd.f32 0.014752088, %v444_v59  ;;  %v434_v62 = vadd.f32 0.0036580483, %v433_v58  ;;  %v470_v63 = vmin.f32 %v469_v60, 16.0 }
 0x1a5   : > { %v446_v3 = vmul.f32 %v445_v61, %v430_v50  ;;  %v471_v4 = vmul.f32 2.1237322e-06, %v470_v63  ;;  %v482_v5 = vmul.f32 3.8918573e-05, %v470_v63  ;;  %v435_v8 = vmul.f32 %v434_v62, %v430_v50 }
 0x1a6   : > { %v425_v61 = vmul.f32 0.5, %v930_v47 }
 0x1a7   : > { %v447_v7 = vadd.f32 0.112945676, %v446_v3  ;;  %v472_v9 = vadd.f32 0.00028619796, %v471_v4  ;;  %v483_v10 = vadd.f32 0.001143296, %v482_v5 }
 0x1a8   : > { %v436_v17 = vadd.f32 0.05243302, %v435_v8  ;;  %v426_v8 = vmul.f32 0.5, %v937_v54 }
 0x1a9   : > { %v448_v12 = vmul.f32 %v447_v7, %v430_v50  ;;  %v473_v13 = vmul.f32 %v472_v9, %v470_v63  ;;  %v484_v14 = vmul.f32 %v483_v10, %v470_v63  ;;  %v813_v10 = vld [vmem:[%s1030_s4] ss:$0 sm:$0xff] }
 0x1aa   : > { %v437_v23 = vmul.f32 %v436_v17, %v430_v50 }
 0x1ab   : > { %v449_v16 = vadd.f32 0.4994258, %v448_v12  ;;  %v485_v18 = vadd.f32 0.014752088, %v484_v14  ;;  %v474_v20 = vadd.f32 0.0036580483, %v473_v13 }
 0x1ac   : > { %v438_v27 = vadd.f32 0.18741608, %v437_v23 }
 0x1ad   : > { %v450_v19 = vmul.f32 %v449_v16, %v430_v50  ;;  %v486_v21 = vmul.f32 %v485_v18, %v470_v63  ;;  %v475_v25 = vmul.f32 %v474_v20, %v470_v63  ;;  %v842_v20 = vmov 32.0  }
 0x1ae   : > { %v439_v32 = vmul.f32 %v438_v27, %v430_v50 }
 0x1af   : > { %v451_v22 = vadd.f32 1.0, %v450_v19  ;;  %v487_v24 = vadd.f32 0.112945676, %v486_v21  ;;  %v476_v29 = vadd.f32 0.05243302, %v475_v25 }
 0x1b0   : > { %v440_v38 = vadd.f32 1.1283791, %v439_v32  ;;  %v586_v32 = vld [vmem:[%s1031_s5 + $0x8] sm:$0xff] }
 0x1b1   : > { %822 = vrcp.f32 %v451_v22  ;;  %v488_v26 = vmul.f32 %v487_v24, %v470_v63  ;;  %v477_v35 = vmul.f32 %v476_v29, %v470_v63  ;;  %v463_v37 = vand.u32 2147483648, %v451_v22 }
 0x1b2   : > { %v461_v40 = vand.u32 2147483647, %v451_v22  ;;  %vm457_vm9 = vweird.f32 %v451_v22  ;;  %v441_v45 = vmul.f32 %v440_v38, %v933_v48 }
 0x1b3   : > { %v489_v28 = vadd.f32 0.4994258, %v488_v26  ;;  %v478_v41 = vadd.f32 0.18741608, %v477_v35  ;;  %v464_v43 = vor.u32 1.1754944e-38, %v463_v37 }
 0x1b4   : > { %vm462_vm11 = vcmp.eq.f32.partialorder %v461_v40, 8.507059e+37 }
 0x1b5   : > { %v490_v30 = vmul.f32 %v489_v28, %v470_v63  ;;  %v479_v50 = vmul.f32 %v478_v41, %v470_v63 }
 0x1b7   : > { %v823_v31 = vpop.eup %822  ;;  %v491_v34 = vadd.f32 1.0, %v490_v30  ;;  %v480_v58 = vadd.f32 1.1283791, %v479_v50  ;;  %v588_v30 = vld [vmem:[%s1031_s5 + $0x18] sm:$0xff] }
 0x1b8   : > { %v453_v33 = vmul.f32 %v823_v31, %v451_v22  ;;  %vm458_vm8 = vweird.f32 %v823_v31  ;;  %646 = vmatpush.msra.mxu2 %v588_v30 }
 0x1b9   : > { %824 = vrcp.f32 %v491_v34  ;;  %vm459_vm10 = vmor %vm457_vm9, %vm458_vm8  ;;  %v503_v55 = vand.u32 2147483648, %v491_v34  ;;  %v501_v60 = vand.u32 2147483647, %v491_v34  ;;  %vm497_vm13 = vweird.f32 %v491_v34 }
 0x1ba   : > { %v454_v36 = vsub.f32 1.0, %v453_v33  ;;  %v481_v63 = vmul.f32 %v480_v58, %v940_v57  ;;  %826 = vrcp.f32 %v842_v20  ;;  %v585_v33 = vld [vmem:[%s1031_s5] sm:$0xff]  ;;  %v596_v58 = vld [vmem:[%s1033_s7 + $0x30] sm:$0xff]  ;;  %vm701_vm9 = vcmask 523264  }
 0x1bb   : > { %v504_v48 = vor.u32 1.1754944e-38, %v503_v55  ;;  %vm502_vm1 = vcmp.eq.f32.partialorder %v501_v60, 8.507059e+37 }
 0x1bc   : > { %v455_v39 = vmul.f32 %v823_v31, %v454_v36 }
 0x1be   : > { %v456_v42 = vadd.f32 %v823_v31, %v455_v39 }
 0x1bf   : > { %v825_v44 = vpop.eup %824 }
 0x1c0   : > { %v460_v46 = vsel %vm459_vm10, %v823_v31, %v456_v42  ;;  %v493_v51 = vmul.f32 %v825_v44, %v491_v34  ;;  %vm498_vm12 = vweird.f32 %v825_v44  ;;  %v587_v31 = vld [vmem:[%s1031_s5 + $0x10] sm:$0xff] }
 0x1c1   : > { %v465_v49 = vsel %vm462_vm11, %v464_v43, %v460_v46  ;;  %vm499_vm15 = vmor %vm497_vm13, %vm498_vm12  ;;  %647 = vmatpush.msra.mxu2 %v587_v31 }
 0x1c2   : > { %v466_v52 = vmul.f32 %v465_v49, %v441_v45  ;;  %v494_v53 = vsub.f32 1.0, %v493_v51  ;;  %v814_v45 = vld [vmem:[%s1032_s6] ss:$0 sm:$0xff] }
 0x1c3   : > { %648 = vmatpush.msra.mxu2 %v586_v32  ;;  %v815_v32 = vld [vmem:[%s1034_s8] ss:$0 sm:$0xff] }
 0x1c4   : > { %v790_v56 = vclamps-f32 %v466_v52, 1.0  ;;  %v495_v59 = vmul.f32 %v825_v44, %v494_v53  ;;  %v597_v53 = vld [vmem:[%s1033_s7 + $0x38] sm:$0xff] }
 0x1c5   : > { %649 = vmatpush.msra.mxu2 %v585_v33  ;;  %713 = vmatpush.msra.mxu3 %v597_v53 }
 0x1c6   : > { %v509_v62 = vadd.f32 1.0, %v790_v56  ;;  %v496_v1 = vadd.f32 %v825_v44, %v495_v59 }
 0x1c7   : > { %714 = vmatpush.msra.mxu3 %v596_v58 }
 0x1c8   : > { %v511_v3 = vmul.f32 %v509_v62, %v425_v61  ;;  %v500_v4 = vsel %vm499_vm15, %v825_v44, %v496_v1  ;;  %v595_v61 = vld [vmem:[%s1033_s7 + $0x28] sm:$0xff] }
 0x1c9   : > { %v505_v5 = vsel %vm502_vm1, %v504_v48, %v500_v4  ;;  %715 = vmatpush.msra.mxu3 %v595_v61  ;;  %v594_v48 = vld [vmem:[%s1033_s7 + $0x20] sm:$0xff]  ;;  %v592_v4 = vld [vmem:[%s1033_s7 + $0x10] sm:$0xff] }
 0x1ca   : > { %792 = vmatmul.msk.f32.vlgmr.msra.gmra.mxu1 %vm516_vm14, %v511_v3  ;;  %v506_v6 = vmul.f32 %v505_v5, %v481_v63  ;;  %v593_v3 = vld [vmem:[%s1033_s7 + $0x18] sm:$0xff] }
 0x1cb   : > { %716 = vmatpush.msra.mxu3 %v594_v48 }
 0x1cc   : > { %v791_v7 = vclamps-f32 %v506_v6, 1.0 }
 0x1cd   : > { %717 = vmatpush.msra.mxu3 %v593_v3 }
 0x1ce   : > { %v510_v9 = vadd.f32 1.0, %v791_v7  ;;  %v591_v7 = vld [vmem:[%s1033_s7 + $0x8] sm:$0xff] }
 0x1cf   : > { %718 = vmatpush.msra.mxu3 %v592_v4 }
 0x1d0   : > { %v512_v47 = vmul.f32 %v510_v9, %v426_v8  ;;  %v590_v9 = vld [vmem:[%s1033_s7] sm:$0xff] }
 0x1d1   : > { %719 = vmatpush.msra.mxu3 %v591_v7 }
 0x1d2   : > { %793 = vmatmul.msk.f32.gmra.mxu1 %vm516_vm14, %v512_v47 }
 0x1d3   : > { %720 = vmatpush.msra.mxu3 %v590_v9 }
 0x247   : > { %v540_v11 = vpop.f32.mrf.mxu1 }
 0x248   : > { %v541_v12 = vadd.f32 %v813_v10, %v540_v11 }
 0x24a   : > { %v546_v57 = vadd.f32 %v541_v12, %v907_v0  ;;  %v827_v0 = vpop.eup %826 }
 0x24b   : > { %v603_v21 = vmul.f32 32.0, %v827_v0  ;;  %vm607_vm2 = vweird.f32 %v827_v0 }
 0x24c   : > { %548 = vxpose.xlu2.b32.start [1/2] (short) (narrow) %v546_v57, 16 }
 0x24d   : > { %v604_v22 = vsub.f32 1.0, %v603_v21 }
 0x24f   : > { %v543_v13 = vpop.f32.mrf.mxu1  ;;  %v605_v23 = vmul.f32 %v827_v0, %v604_v22 }
 0x250   : > { %v544_v14 = vadd.f32 %v813_v10, %v543_v13 }
 0x252   : > { %v547_v15 = vadd.f32 %v544_v14, %v911_v2  ;;  %v606_v2 = vadd.f32 %v827_v0, %v605_v23 }
 0x254   : > { %549 = vxpose.xlu2.b32.end [2/2] (short) (narrow) %v547_v15, 16  ;;  %v608_v24 = vsel %vm607_vm2, %v827_v0, %v606_v2 }
 0x2e5   : > { %v564_v16 = vpop.trf.xlu2 }
 0x2ed   : > { %v565_v54 = vpop.trf.xlu2 }
 0x2ee   : > { %581 = vrot.lane.b32.xlu0 %v565_v54, %s841_s12 }
 0x360   : > { %v582_v17 = vpop.permute.xlu0 %581 }
 0x361   : > { %v968_v18 = vsel %vm341_vm0, %v564_v16, %v582_v17 }
 0x362   : > { %v599_v19 = vsel %vm516_vm14, %v968_v18, 0.0 }
 0x363   : > { %600 = vadd.xlane.f32.xlu1 %v599_v19 }
 0x3d6   : > { %v601_v25 = vpop.xlane.xlu1 %600 }
 0x3d7   : > { %v609_v26 = vmul.f32 %v608_v24, %v601_v25 }
 0x3d9   : > { %v610_v27 = vsub.f32 %v968_v18, %v609_v26 }
 0x3db   : > { %v611_v28 = vmul.f32 %v610_v27, %v610_v27 }
 0x3dd   : > { %v612_v29 = vsel %vm516_vm14, %v611_v28, 0.0 }
 0x3de   : > { %613 = vadd.xlane.f32.xlu2 %v612_v29 }
 0x451   : > { %v614_v34 = vpop.xlane.xlu2 %613 }
 0x452   : > { %v615_v35 = vmul.f32 %v614_v34, %v608_v24 }
 0x454   : > { %v616_v36 = vadd.f32 1e-05, %v615_v35 }
 0x456   : > { %828 = vrsqrt.f32 %v616_v36  ;;  %vm623_vm3 = vweird.f32 %v616_v36 }
 0x45c   : > { %v829_v37 = vpop.eup %828 }
 0x45d   : > { %v618_v38 = vmul.f32 %v829_v37, %v616_v36  ;;  %vm624_vm0 = vweird.f32 %v829_v37 }
 0x45e   : > { %vm625_vm4 = vmor %vm623_vm3, %vm624_vm0 }
 0x45f   : > { %v619_v39 = vmul.f32 %v829_v37, %v618_v38 }
 0x461   : > { %v620_v40 = vmul.f32 0.5, %v619_v39 }
 0x463   : > { %v621_v41 = vsub.f32 1.5, %v620_v40 }
 0x465   : > { %v622_v42 = vmul.f32 %v829_v37, %v621_v41 }
 0x467   : > { %v626_v43 = vsel %vm625_vm4, %v829_v37, %v622_v42 }
 0x468   : > { %v627_v44 = vmul.f32 %v626_v43, %v610_v27 }
 0x46a   : > { %794 = vmatmul.msk.f32.vlgmr.msra.gmra.mxu2 %vm516_vm14, %v627_v44 }
 0x4ed   : > { %v651_v46 = vpop.f32.mrf.mxu2 }
 0x4ee   : > { %v652_v49 = vadd.f32 %v814_v45, %v651_v46 }
 0x4f0   : > { %v655_v50 = vmul.f32 0.70710677, %v652_v49  ;;  %v654_v29 = vmul.f32 0.5, %v652_v49 }
 0x4f2   : > { %v656_v51 = vmul.f32 %v655_v50, %v655_v50 }
 0x4f4   : > { %v657_v52 = vmin.f32 %v656_v51, 16.0 }
 0x4f6   : > { %v658_v55 = vmul.f32 2.1237322e-06, %v657_v52  ;;  %v669_v56 = vmul.f32 3.8918573e-05, %v657_v52 }
 0x4f8   : > { %v659_v59 = vadd.f32 0.00028619796, %v658_v55  ;;  %v670_v60 = vadd.f32 0.001143296, %v669_v56 }
 0x4fa   : > { %v660_v62 = vmul.f32 %v659_v59, %v657_v52  ;;  %v671_v1 = vmul.f32 %v670_v60, %v657_v52 }
 0x4fc   : > { %v672_v63 = vadd.f32 0.014752088, %v671_v1  ;;  %v661_v5 = vadd.f32 0.0036580483, %v660_v62 }
 0x4fe   : > { %v673_v6 = vmul.f32 %v672_v63, %v657_v52  ;;  %v662_v47 = vmul.f32 %v661_v5, %v657_v52 }
 0x500   : > { %v674_v8 = vadd.f32 0.112945676, %v673_v6  ;;  %v663_v12 = vadd.f32 0.05243302, %v662_v47 }
 0x502   : > { %v675_v10 = vmul.f32 %v674_v8, %v657_v52  ;;  %v664_v14 = vmul.f32 %v663_v12, %v657_v52 }
 0x504   : > { %v676_v11 = vadd.f32 0.4994258, %v675_v10  ;;  %v665_v15 = vadd.f32 0.18741608, %v664_v14 }
 0x506   : > { %v677_v57 = vmul.f32 %v676_v11, %v657_v52  ;;  %v666_v54 = vmul.f32 %v665_v15, %v657_v52 }
 0x508   : > { %v678_v13 = vadd.f32 1.0, %v677_v57  ;;  %v667_v0 = vadd.f32 1.1283791, %v666_v54 }
 0x50a   : > { %830 = vrcp.f32 %v678_v13  ;;  %v690_v20 = vand.u32 2147483648, %v678_v13  ;;  %v688_v22 = vand.u32 2147483647, %v678_v13  ;;  %vm684_vm6 = vweird.f32 %v678_v13 }
 0x50b   : > { %v668_v24 = vmul.f32 %v667_v0, %v655_v50 }
 0x50c   : > { %v691_v2 = vor.u32 1.1754944e-38, %v690_v20  ;;  %vm689_vm8 = vcmp.eq.f32.partialorder %v688_v22, 8.507059e+37 }
 0x510   : > { %v831_v16 = vpop.eup %830 }
 0x511   : > { %v680_v17 = vmul.f32 %v831_v16, %v678_v13  ;;  %vm685_vm5 = vweird.f32 %v831_v16 }
 0x512   : > { %vm686_vm7 = vmor %vm684_vm6, %vm685_vm5 }
 0x513   : > { %v681_v19 = vsub.f32 1.0, %v680_v17 }
 0x515   : > { %v682_v21 = vmul.f32 %v831_v16, %v681_v19 }
 0x517   : > { %v683_v23 = vadd.f32 %v831_v16, %v682_v21 }
 0x519   : > { %v687_v25 = vsel %vm686_vm7, %v831_v16, %v683_v23 }
 0x51a   : > { %v692_v26 = vsel %vm689_vm8, %v691_v2, %v687_v25 }
 0x51b   : > { %v693_v27 = vmul.f32 %v692_v26, %v668_v24 }
 0x51d   : > { %v795_v28 = vclamps-f32 %v693_v27, 1.0 }
 0x51f   : > { %v696_v30 = vadd.f32 1.0, %v795_v28 }
 0x521   : > { %v697_v31 = vmul.f32 %v696_v30, %v654_v29 }
 0x523   : > { %796 = vmatmul.msk.f32.vlgmr.msra.gmra.mxu3 %vm701_vm9, %v697_v31 }
 0x5a6   : > { %v722_v33 = vpop.f32.mrf.mxu3 }
 0x5a7   : > { %v723_v34 = vadd.f32 %v815_v32, %v722_v33 }
 0x5a9   : > { %v725_v35 = vadd.f32 %v723_v34, %v968_v18 }
 0x5ab   : > { %726 = vst.msk [vmem:[%s330_s25] sm:$0xff] %vm516_vm14, %v725_v35 }
 0x5ac PF: > { %s19_s30 = sadd.s32 1, %s838_s30  }
 0x5ad   : > { %p16_p4 = scmp.ge.s32.totalorder %s19_s30, 4  }
 0x5af   :  { %18 = sbr.rel (!%p16_p4) target bundleno = 1 (0x1), region = 86 }

</bundles_post_ra>
